<compile_context>
chip_gen: v6e
topology: v6e:2x2x1
jax: 0.10.0
libtpu: 0.0.40
codegen_flags: <defaults>
</compile_context>

<pallas_src>
import functools

import jax
import jax.numpy as jnp
from jax.experimental import pallas as pl
from jax.experimental.pallas import tpu as pltpu  # noqa: F401  (TPU backend)


def _bilinear_weight_matrix(out_size: int, in_size: int) -> jnp.ndarray:
    """Dense (out_size, in_size) bilinear interpolation matrix.

    Matches torch.nn.functional.interpolate(mode='bilinear',
    align_corners=False): src = (i + 0.5) * (in/out) - 0.5, clamped at 0,
    indices clamped at in_size - 1.
    """
    scale = in_size / out_size
    i = jnp.arange(out_size, dtype=jnp.float32)
    src = jnp.clip((i + 0.5) * scale - 0.5, 0.0, None)
    idx0 = jnp.clip(jnp.floor(src).astype(jnp.int32), 0, in_size - 1)
    idx1 = jnp.minimum(idx0 + 1, in_size - 1)
    frac = src - idx0.astype(jnp.float32)
    rows = jnp.arange(out_size)
    w = jnp.zeros((out_size, in_size), dtype=jnp.float32)
    w = w.at[rows, idx0].add(1.0 - frac)
    w = w.at[rows, idx1].add(frac)
    return w


def _preprocess_kernel(x_ref, wh_ref, wwt_ref, o_ref, *, channels: int):
    # x_ref:   (H, W*C)    uint8 HWC image viewed as 2-D (no transpose done)
    # wh_ref:  (S, H)      bf16 row-interpolation weights
    # wwt_ref: (C, W*C, S) f32 per-channel column weights, 1/255 folded in
    # o_ref:   (C, S, S)   float32 output in CHW layout
    #
    # Conservative two-step cast (u8 -> f32 -> bf16); bf16 operands keep the
    # first matmul on the MXU's native bf16 path with f32 accumulation.
    x = x_ref[...].astype(jnp.float32).astype(jnp.bfloat16)
    # One batched MXU matmul covering all channels: (S, H) @ (H, W*C).
    tmp = jnp.dot(wh_ref[...], x, preferred_element_type=jnp.float32)  # (S, W*C) f32
    for c in range(channels):  # tiny static channel count (C == 3)
        # (S, W*C) @ (W*C, S): the selector weights pick out channel c's
        # interleaved columns and apply the column interpolation + 1/255.
        o_ref[c] = jnp.dot(tmp, wwt_ref[c], preferred_element_type=jnp.float32)


@functools.partial(jax.jit, static_argnames="input_size")
def preprocess(x_hwc: jnp.ndarray, input_size: int = 32) -> jnp.ndarray:
    """JAX/Pallas equivalent of Preprocess.forward.

    Args:
      x_hwc: (H, W, C) image array (e.g. uint8 in [0, 255]).
      input_size: target spatial size S.

    Returns:
      (C, S, S) float32 tensor: image_to_tensor + /255 + bilinear resize.
    """
    H, W, C = x_hwc.shape
    S = int(input_size)

    # Free, contiguous reshape (no transpose, no extra HBM pass under jit).
    x2d = x_hwc.reshape(H, W * C)

    # Row weights in bf16 (power-of-two resize fractions such as 0.25/0.75 are
    # exact in bf16); accumulation stays f32 inside the kernel.
    wh = _bilinear_weight_matrix(S, H).astype(jnp.bfloat16)          # (S, H)

    # Column weights with the 1/255 normalization folded in, expanded into one
    # (W*C, S) selector matrix per channel for the interleaved intermediate.
    wwt = _bilinear_weight_matrix(S, W).T * (1.0 / 255.0)            # (W, S) f32
    wwt_stack = jnp.zeros((C, W * C, S), dtype=jnp.float32)
    w_rows = jnp.arange(W)
    for c in range(C):
        wwt_stack = wwt_stack.at[c, w_rows * C + c, :].set(wwt)

    kernel = functools.partial(_preprocess_kernel, channels=C)
    out = pl.pallas_call(
        kernel,
        out_shape=jax.ShapeDtypeStruct((C, S, S), jnp.float32),
        grid=(1,),  # single step: whole problem in one kernel invocation
        in_specs=[
            pl.BlockSpec((H, W * C), lambda i: (0, 0)),
            pl.BlockSpec((S, H), lambda i: (0, 0)),
            pl.BlockSpec((C, W * C, S), lambda i: (0, 0, 0)),
        ],
        out_specs=pl.BlockSpec((C, S, S), lambda i: (0, 0, 0)),
    )(x2d, wh, wwt_stack)
    return out


if __name__ == "__main__":
    key = jax.random.PRNGKey(0)
    H, W, C = 16, 16, 3
    input_size = 32
    # deterministic synthetic "image": uint8-style values in [0, 255]
    x = jax.random.randint(key, (H, W, C), 0, 256, dtype=jnp.int32).astype(jnp.uint8)

    y = preprocess(x, input_size=input_size)
    y = jax.block_until_ready(y)

    assert y.shape == (C, input_size, input_size), y.shape
    assert y.dtype == jnp.float32, y.dtype
    assert bool(jnp.all(jnp.isfinite(y)))
    assert float(jnp.max(y)) <= 1.0 + 1e-5 and float(jnp.min(y)) >= -1e-5

    # Pure-JAX f32 reference: CHW transpose + /255 + separable bilinear resize.
    wh_ref = _bilinear_weight_matrix(input_size, H)
    ww_ref = _bilinear_weight_matrix(input_size, W)
    x_chw = jnp.transpose(x, (2, 0, 1)).astype(jnp.float32) / 255.0
    ref = jnp.einsum("sh,chw,tw->cst", wh_ref, x_chw, ww_ref)
    max_err = float(jnp.max(jnp.abs(y - ref)))
    assert max_err < 5e-3, max_err

    print("KERNEL_OK")
</pallas_src>

<mosaic_0001>
module attributes {stable_mosaic.version = 11 : i64} {
  func.func private @main(%arg0: i32) attributes {dimension_semantics = [#tpu.dimension_semantics<core_parallel>], iteration_bounds = array<i64: 2>, tpu.core_type = #tpu.core_type<sc_scalar_subcore>, window_params = []} {
    return
  }
}

module attributes {stable_mosaic.version = 11 : i64} {
  func.func private @main(%arg0: i32) attributes {dimension_semantics = [#tpu.dimension_semantics<core_parallel>], iteration_bounds = array<i64: 2>, tpu.core_type = #tpu.core_type<sc_scalar_subcore>, window_params = []} {
    return
  }
}

module attributes {stable_mosaic.version = 11 : i64} {
  func.func @_preprocess_kernel(%arg0: i32, %arg1: memref<16x48xi8, #tpu.memory_space<vmem>>, %arg2: memref<32x16xbf16, #tpu.memory_space<vmem>>, %arg3: memref<3x48x32xf32, #tpu.memory_space<vmem>>, %arg4: memref<3x32x32xf32, #tpu.memory_space<vmem>>) attributes {dimension_semantics = [#tpu.dimension_semantics<arbitrary>], iteration_bounds = array<i64: 1>, scalar_prefetch = 0 : i64, scratch_operands = 0 : i64, tpu.core_type = #tpu.core_type<tc>, window_params = [{pipeline_mode = #tpu.pipeline_mode<synchronous>, transform_indices = @transform_0, window_bounds = array<i64: 16, 48>}, {pipeline_mode = #tpu.pipeline_mode<synchronous>, transform_indices = @transform_1, window_bounds = array<i64: 32, 16>}, {pipeline_mode = #tpu.pipeline_mode<synchronous>, transform_indices = @transform_2, window_bounds = array<i64: 3, 48, 32>}, {pipeline_mode = #tpu.pipeline_mode<synchronous>, transform_indices = @transform_3, window_bounds = array<i64: 3, 32, 32>}]} {
    %c0 = arith.constant 0 : index
    %c0_0 = arith.constant 0 : index
    %0 = vector.load %arg1[%c0, %c0_0] : memref<16x48xi8, #tpu.memory_space<vmem>>, vector<16x48xi8>
    %1 = arith.uitofp %0 : vector<16x48xi8> to vector<16x48xf32>
    %2 = arith.truncf %1 : vector<16x48xf32> to vector<16x48xbf16>
    %c0_1 = arith.constant 0 : index
    %c0_2 = arith.constant 0 : index
    %3 = vector.load %arg2[%c0_1, %c0_2] : memref<32x16xbf16, #tpu.memory_space<vmem>>, vector<32x16xbf16>
    %cst = arith.constant dense<0.000000e+00> : vector<32x48xf32>
    %4 = tpu.matmul %3, %2, %cst {dimension_numbers = #tpu.dot_dimension_numbers<[1], [0], [0], [1], [0, 0, 1, 1], [], []>} : vector<32x16xbf16>, vector<16x48xbf16>, vector<32x48xf32> -> vector<32x48xf32>
    %c0_3 = arith.constant 0 : index
    %c0_4 = arith.constant 0 : index
    %c0_5 = arith.constant 0 : index
    %5 = vector.load %arg3[%c0_3, %c0_4, %c0_5] : memref<3x48x32xf32, #tpu.memory_space<vmem>>, vector<1x48x32xf32>
    %6 = vector.shape_cast %5 : vector<1x48x32xf32> to vector<48x32xf32>
    %cst_6 = arith.constant dense<0.000000e+00> : vector<32x32xf32>
    %7 = tpu.matmul %4, %6, %cst_6 {dimension_numbers = #tpu.dot_dimension_numbers<[1], [0], [0], [1], [0, 0, 1, 1], [], []>} : vector<32x48xf32>, vector<48x32xf32>, vector<32x32xf32> -> vector<32x32xf32>
    %c0_7 = arith.constant 0 : index
    %c0_8 = arith.constant 0 : index
    %c0_9 = arith.constant 0 : index
    %8 = vector.load %arg4[%c0_7, %c0_8, %c0_9] : memref<3x32x32xf32, #tpu.memory_space<vmem>>, vector<1x32x32xf32>
    %9 = vector.shape_cast %8 : vector<1x32x32xf32> to vector<32x32xf32>
    %10 = vector.shape_cast %7 : vector<32x32xf32> to vector<1x32x32xf32>
    tpu.vector_store %arg4[%c0_7, %c0_8, %c0_9], %10 {strides = array<i32>} : memref<3x32x32xf32, #tpu.memory_space<vmem>>, vector<1x32x32xf32>,
    %c1 = arith.constant 1 : index
    %c0_10 = arith.constant 0 : index
    %c0_11 = arith.constant 0 : index
    %11 = vector.load %arg3[%c1, %c0_10, %c0_11] : memref<3x48x32xf32, #tpu.memory_space<vmem>>, vector<1x48x32xf32>
    %12 = vector.shape_cast %11 : vector<1x48x32xf32> to vector<48x32xf32>
    %cst_12 = arith.constant dense<0.000000e+00> : vector<32x32xf32>
    %13 = tpu.matmul %4, %12, %cst_12 {dimension_numbers = #tpu.dot_dimension_numbers<[1], [0], [0], [1], [0, 0, 1, 1], [], []>} : vector<32x48xf32>, vector<48x32xf32>, vector<32x32xf32> -> vector<32x32xf32>
    %c1_13 = arith.constant 1 : index
    %c0_14 = arith.constant 0 : index
    %c0_15 = arith.constant 0 : index
    %14 = vector.load %arg4[%c1_13, %c0_14, %c0_15] : memref<3x32x32xf32, #tpu.memory_space<vmem>>, vector<1x32x32xf32>
    %15 = vector.shape_cast %14 : vector<1x32x32xf32> to vector<32x32xf32>
    %16 = vector.shape_cast %13 : vector<32x32xf32> to vector<1x32x32xf32>
    tpu.vector_store %arg4[%c1_13, %c0_14, %c0_15], %16 {strides = array<i32>} : memref<3x32x32xf32, #tpu.memory_space<vmem>>, vector<1x32x32xf32>,
    %c2 = arith.constant 2 : index
    %c0_16 = arith.constant 0 : index
    %c0_17 = arith.constant 0 : index
    %17 = vector.load %arg3[%c2, %c0_16, %c0_17] : memref<3x48x32xf32, #tpu.memory_space<vmem>>, vector<1x48x32xf32>
    %18 = vector.shape_cast %17 : vector<1x48x32xf32> to vector<48x32xf32>
    %cst_18 = arith.constant dense<0.000000e+00> : vector<32x32xf32>
    %19 = tpu.matmul %4, %18, %cst_18 {dimension_numbers = #tpu.dot_dimension_numbers<[1], [0], [0], [1], [0, 0, 1, 1], [], []>} : vector<32x48xf32>, vector<48x32xf32>, vector<32x32xf32> -> vector<32x32xf32>
    %c2_19 = arith.constant 2 : index
    %c0_20 = arith.constant 0 : index
    %c0_21 = arith.constant 0 : index
    %20 = vector.load %arg4[%c2_19, %c0_20, %c0_21] : memref<3x32x32xf32, #tpu.memory_space<vmem>>, vector<1x32x32xf32>
    %21 = vector.shape_cast %20 : vector<1x32x32xf32> to vector<32x32xf32>
    %22 = vector.shape_cast %19 : vector<32x32xf32> to vector<1x32x32xf32>
    tpu.vector_store %arg4[%c2_19, %c0_20, %c0_21], %22 {strides = array<i32>} : memref<3x32x32xf32, #tpu.memory_space<vmem>>, vector<1x32x32xf32>,
    return
  }
  func.func @transform_0(%arg0: i32) -> (i32, i32) {
    %c0_i32 = arith.constant 0 : i32
    %c0_i32_0 = arith.constant 0 : i32
    %c0_i32_1 = arith.constant 0 : i32
    return %c0_i32, %c0_i32_0 : i32, i32
  }
  func.func @transform_1(%arg0: i32) -> (i32, i32) {
    %c0_i32 = arith.constant 0 : i32
    %c0_i32_0 = arith.constant 0 : i32
    %c0_i32_1 = arith.constant 0 : i32
    return %c0_i32, %c0_i32_0 : i32, i32
  }
  func.func @transform_2(%arg0: i32) -> (i32, i32, i32) {
    %c0_i32 = arith.constant 0 : i32
    %c0_i32_0 = arith.constant 0 : i32
    %c0_i32_1 = arith.constant 0 : i32
    %c0_i32_2 = arith.constant 0 : i32
    return %c0_i32, %c0_i32_0, %c0_i32_1 : i32, i32, i32
  }
  func.func @transform_3(%arg0: i32) -> (i32, i32, i32) {
    %c0_i32 = arith.constant 0 : i32
    %c0_i32_0 = arith.constant 0 : i32
    %c0_i32_1 = arith.constant 0 : i32
    %c0_i32_2 = arith.constant 0 : i32
    return %c0_i32, %c0_i32_0, %c0_i32_1 : i32, i32, i32
  }
}

</mosaic_0001>

<bundles_post_ra>
// kernel: preprocess.1
= control target key start
LH: loop header
LB: loop body
LE: loop exit
PB: predicated region body
PF: predicated region fallthrough
CT: control target
= control target key end

     0   :  { %vm40_vm0 = vcmask 130048   ;;  %s682_s0 = inlined_call_operand.vmem [shape: u8[16,48], index: 0, kind: input, shape index: {}]   ;;  %s683_s1 = inlined_call_operand.vmem [shape: bf16[32,16], index: 1, kind: input, shape index: {}]   ;;  %s684_s2 = inlined_call_operand.vmem [shape: f32[3,48,32], index: 2, kind: input, shape index: {}]   ;;  %s685_s3 = inlined_call_operand.hbm [shape: f32[3,32,32], index: 3, kind: output, shape index: {}]  }
   0x1   :  { %v16_v0 = vld [vmem:[%s682_s0] sm:$0x3]  ;;  %v17_v1 = vld [vmem:[%s682_s0 + $0x2] sm:$0x3]  ;;  %v101_v5 = vld [vmem:[%s684_s2 + $0x28] sm:$0xff] }
   0x2   :  { %v18_v2 = vunpack.c.l.u8.bf16 %v16_v0  ;;  %v19_v3 = vunpack.c.l.u8.bf16 %v17_v1  ;;  %v540_v4 = vld [vmem:[%s683_s1] sm:$0xff]   ;;  %483 = vmatprep.subr.mxu1 %v101_v5  ;;  %v429_v8 = vld [vmem:[%s684_s2 + $0x58] sm:$0xff] }
   0x3   :  { %479 = vmatprep.mubr.msk.bf16.mxu0 %vm40_vm0, %v540_v4  ;;  %v100_v7 = vld [vmem:[%s684_s2 + $0x20] sm:$0xff]  ;;  %484 = vmatpush3.msra.mxu1 %v101_v5  ;;  %v99_v9 = vld [vmem:[%s684_s2 + $0x18] sm:$0xff] }
   0x4   :  { %v417_v6 = vcombine.low %v18_v2, %v19_v3 }
   0x5   :  { %8 = vsyncpa [#allocation3], 0  ;;  %v541_v10 = vld [vmem:[%s683_s1 + $0x8] sm:$0xff]   ;;  %485 = vmatprep.subr.mxu1 %v100_v7  ;;  %v428_v11 = vld [vmem:[%s684_s2 + $0x50] sm:$0xff]  ;;  %vm102_vm1 = vcmask 392192   ;;  %vm200_vm2 = vcmask 261120  }
   0x6   :  { %477 = vmatprep.subr.bf16.mxu0 %v417_v6  ;;  %486 = vmatpush3.msra.mxu1 %v100_v7  ;;  %v427_v12 = vld [vmem:[%s684_s2 + $0x48] sm:$0xff]  ;;  %v98_v13 = vld [vmem:[%s684_s2 + $0x10] sm:$0xff]  ;;  %v426_v14 = vld [vmem:[%s684_s2 + $0x40] sm:$0xff] }
   0x7   :  { %478 = vmatpush3.bf16.msra.mxu0 %v417_v6  ;;  %487 = vmatprep.subr.mxu1 %v99_v9  ;;  %v97_v15 = vld [vmem:[%s684_s2 + $0x8] sm:$0xff]  ;;  %v425_v16 = vld [vmem:[%s684_s2 + $0x38] sm:$0xff]  ;;  %v96_v17 = vld [vmem:[%s684_s2] sm:$0xff] }
   0x8   :  { %501 = vmatprep.subr.mxu0 %v429_v8  ;;  %488 = vmatpush3.msra.mxu1 %v99_v9  ;;  %v424_v18 = vld [vmem:[%s684_s2 + $0x30] sm:$0xff]  ;;  %v439_v19 = vld [vmem:[%s684_s2 + $0x88] sm:$0xff]  ;;  %v438_v24 = vld [vmem:[%s684_s2 + $0x80] sm:$0xff] }
   0x9   :  { %489 = vmatprep.subr.mxu1 %v98_v13  ;;  %v437_v25 = vld [vmem:[%s684_s2 + $0x78] sm:$0xff]  ;;  %v436_v26 = vld [vmem:[%s684_s2 + $0x70] sm:$0xff]  ;;  %v435_v27 = vld [vmem:[%s684_s2 + $0x68] sm:$0xff] }
   0xa   :  { %480 = vmatmul.mubr.msk.bf16.vlgmr.msra.gmra.mxu0 %vm40_vm0, %v541_v10  ;;  %490 = vmatpush3.msra.mxu1 %v98_v13  ;;  %v434_v28 = vld [vmem:[%s684_s2 + $0x60] sm:$0xff]  ;;  %s564_s2 = smov [#allocation2]  }
   0xb   :  { %502 = vmatpush3.msra.mxu0 %v429_v8  ;;  %491 = vmatprep.subr.mxu1 %v97_v15  ;;  %s404_s26 = sshll.u32 %s564_s2, 4  ;;  %s405_s26 = int_to_ptr.vmem [resolvable:$true] %s404_s26 }
   0xc   :  { %503 = vmatprep.subr.mxu0 %v428_v11  ;;  %492 = vmatpush3.msra.mxu1 %v97_v15  ;;  %s542_s27 = scalar_lea.vmem %s405_s26, 1536  ;;  %p547_p1 = scmp.lt.s32.totalorder %s405_s26, %s405_s26 }
   0xd   :  { %504 = vmatpush3.msra.mxu0 %v428_v11  ;;  %493 = vmatprep.subr.mxu1 %v96_v17  ;;  %p543_p0 = scmp.ne.s32.totalorder %s405_s26, %s542_s27  ;;  %p548_p2 = scmp.lt.s32.totalorder %s542_s27, %s542_s27 }
   0xe   :  { %505 = vmatprep.subr.mxu0 %v427_v12  ;;  %494 = vmatpush3.msra.mxu1 %v96_v17 }
   0xf   :  { %506 = vmatpush3.msra.mxu0 %v427_v12  ;;  %519 = vmatprep.subr.mxu1 %v439_v19  ;;  %p549_p3 = por %p548_p2, %p547_p1 }
  0x10   :  { %507 = vmatprep.subr.mxu0 %v426_v14 }
  0x11   :  { %508 = vmatpush3.msra.mxu0 %v426_v14  ;;  %p550_p4 = pnand %p549_p3, %p543_p0 }
  0x12   :  { %509 = vmatprep.subr.mxu0 %v425_v16 }
  0x13   :  { %510 = vmatpush3.msra.mxu0 %v425_v16 }
  0x14   :  { %511 = vmatprep.subr.mxu0 %v424_v18 }
  0x15   :  { %512 = vmatpush3.msra.mxu0 %v424_v18 }
  0xca   :  { %v481_v20 = vpop.f32.mrf.mxu0 }
  0xcc   :  { %v81_v21 = vpop.f32.mrf.mxu0 }
  0xcd   :  { %495 = vmatprep.mubr.msk.f32.mxu1 %vm102_vm1, %v81_v21  ;;  %513 = vmatprep.mubr.msk.f32.mxu0 %vm102_vm1, %v81_v21 }
  0xce   :  { %v482_v22 = vpop.f32.mrf.mxu0 }
  0xd0   :  { %v84_v23 = vpop.f32.mrf.mxu0 }
  0xd1   :  { %496 = vmatmul.mubr.msk.f32.vlgmr.msra.gmra.mxu1 %vm102_vm1, %v84_v23  ;;  %514 = vmatmul.mubr.msk.f32.vlgmr.msra.gmra.mxu0 %vm102_vm1, %v84_v23 }
  0xd2   :  { %520 = vmatpush3.msra.mxu1 %v439_v19  ;;  %498 = vmatprep.mubr.msk.f32.mxu1 %vm102_vm1, %v481_v20 }
  0xd3   :  { %516 = vmatprep.mubr.msk.f32.mxu0 %vm102_vm1, %v481_v20  ;;  %521 = vmatprep.subr.mxu1 %v438_v24 }
  0xd4   :  { %522 = vmatpush3.msra.mxu1 %v438_v24 }
  0xd5   :  { %523 = vmatprep.subr.mxu1 %v437_v25  ;;  %499 = vmatmul.mubr.msk.f32.gmra.mxu1 %vm102_vm1, %v482_v22 }
  0xd6   :  { %517 = vmatmul.mubr.msk.f32.gmra.mxu0 %vm102_vm1, %v482_v22  ;;  %524 = vmatpush3.msra.mxu1 %v437_v25 }
  0xd7   :  { %525 = vmatprep.subr.mxu1 %v436_v26  ;;  %531 = vmatprep.mubr.msk.f32.mxu1 %vm102_vm1, %v81_v21 }
  0xd8   :  { %526 = vmatpush3.msra.mxu1 %v436_v26 }
  0xd9   :  { %527 = vmatprep.subr.mxu1 %v435_v27 }
  0xda   :  { %528 = vmatpush3.msra.mxu1 %v435_v27 }
  0xdb   :  { %529 = vmatprep.subr.mxu1 %v434_v28 }
  0xdc   :  { %530 = vmatpush3.msra.mxu1 %v434_v28 }
  0xdd   :  { %532 = vmatmul.mubr.msk.f32.vlgmr.msra.gmra.mxu1 %vm102_vm1, %v84_v23 }
  0xde   :  { %534 = vmatprep.mubr.msk.f32.mxu1 %vm102_vm1, %v481_v20 }
  0xe1   :  { %535 = vmatmul.mubr.msk.f32.gmra.mxu1 %vm102_vm1, %v482_v22 }
 0x191   :  { %v497_v29 = vpop.f32.mrf.mxu1  ;;  %v515_v30 = vpop.f32.mrf.mxu0 }
 0x192   :  { %202 = vst.msk [vmem:[#allocation2 + $0x8] sm:$0xff] %vm200_vm2, %v497_v29  ;;  %299 = vst.msk [vmem:[#allocation2 + $0x28] sm:$0xff] %vm200_vm2, %v515_v30 }
 0x193   :  { %v181_v31 = vpop.f32.mrf.mxu1  ;;  %v278_v32 = vpop.f32.mrf.mxu0 }
 0x194   :  { %201 = vst.msk [vmem:[#allocation2] sm:$0xff] %vm200_vm2, %v181_v31  ;;  %298 = vst.msk [vmem:[#allocation2 + $0x20] sm:$0xff] %vm200_vm2, %v278_v32 }
 0x195   :  { %v500_v33 = vpop.f32.mrf.mxu1 }
 0x196   :  { %204 = vst.msk [vmem:[#allocation2 + $0x18] sm:$0xff] %vm200_vm2, %v500_v33  ;;  %v518_v34 = vpop.f32.mrf.mxu0 }
 0x197   :  { %301 = vst.msk [vmem:[#allocation2 + $0x38] sm:$0xff] %vm200_vm2, %v518_v34  ;;  %v191_v35 = vpop.f32.mrf.mxu1 }
 0x198   :  { %203 = vst.msk [vmem:[#allocation2 + $0x10] sm:$0xff] %vm200_vm2, %v191_v35  ;;  %v288_v36 = vpop.f32.mrf.mxu0 }
 0x199   :  { %300 = vst.msk [vmem:[#allocation2 + $0x30] sm:$0xff] %vm200_vm2, %v288_v36 }
 0x19d   :  { %v533_v37 = vpop.f32.mrf.mxu1 }
 0x19e   :  { %396 = vst.msk [vmem:[#allocation2 + $0x48] sm:$0xff] %vm200_vm2, %v533_v37 }
 0x19f   :  { %v375_v38 = vpop.f32.mrf.mxu1 }
 0x1a0   :  { %395 = vst.msk [vmem:[#allocation2 + $0x40] sm:$0xff] %vm200_vm2, %v375_v38 }
 0x1a1   :  { %v536_v39 = vpop.f32.mrf.mxu1 }
 0x1a2   :  { %398 = vst.msk [vmem:[#allocation2 + $0x58] sm:$0xff] %vm200_vm2, %v536_v39 }
 0x1a3   :  { %v385_v40 = vpop.f32.mrf.mxu1 }
 0x1a4   :  { %397 = vst.msk [vmem:[#allocation2 + $0x50] sm:$0xff] %vm200_vm2, %v385_v40 }
 0x1a5   :  { %553 = shalt.err (!%p550_p4)
}
 0x1a6   :  { %s565_s28 = smov 128   ;;  %s566_s29 = smov 8  }
 0x1a7   :  { %410 = dma.vmem_to_hbm [thread:$0]  %s405_s26, 1536, %s685_s3, [#allocation3], %s565_s28, %s565_s28, %s566_s29  }
 0x1a8   :  { %562 = dma.done.wait [#allocation3], 1536  }
 0x1a9   :  { %563 = vsyncadd [#allocation3], 4294965760 }
 0x1aa   :  { %414 = vsyncpa [#allocation3], 1 }

</bundles_post_ra>
